<compile_context>
chip_gen: v7x
topology: tpu7x:2x2x1
jax: 0.10.0
libtpu: 0.0.40
codegen_flags: <defaults>
</compile_context>

<pallas_src>
import jax
import jax.numpy as jnp
import numpy as np
from jax.experimental import pallas as pl
from jax.experimental.pallas import tpu as pltpu

# Stoichiometry matrix (5 species x 12 reactions), from the reference script.
S_NP = np.array(
    [[-2, 2, -1, 1, 0, 0, 0, 0, 1, -1, -1, 1],
     [1, -1, 0, 0, 0, 0, -1, 1, -1, 1, 0, 0],
     [0, 0, 1, -1, 0, 0, 2, -2, 1, -1, 1, -1],
     [0, 0, -1, 1, -2, 2, 0, 0, -1, 1, 1, -1],
     [0, 0, 0, 0, 1, -1, -1, 1, 0, 0, -1, 1]],
    dtype=np.float64)

NUM_REACTIONS = 12
SIZE_IN = 5
LANE = 128
SUBLANE = 8


def _rhs_kernel(p_ref, x_ref, o_ref):
    # p_ref: (12,) f32 in SMEM (p_j = 10**w_j)
    # x_ref: (5, rt, 128) f32 in VMEM -- species major, dense (sublane, lane) slab
    # o_ref: (5, rt, 128) f32 in VMEM
    z0 = x_ref[0]
    z1 = x_ref[1]
    z2 = x_ref[2]
    z3 = x_ref[3]
    z4 = x_ref[4]

    # Net fluxes: every stoichiometry column pair (2k, 2k+1) is +/-, so only
    # g_k = f_{2k} - f_{2k+1} is needed (6 live temporaries instead of 12).
    g0 = p_ref[0] * (z0 * z0) - p_ref[1] * z1
    g1 = p_ref[2] * (z0 * z3) - p_ref[3] * z2
    g2 = p_ref[4] * (z3 * z3) - p_ref[5] * z4
    g3 = p_ref[6] * (z1 * z4) - p_ref[7] * (z2 * z2)
    g4 = p_ref[8] * (z1 * z3) - p_ref[9] * (z2 * z0)
    g5 = p_ref[10] * (z4 * z0) - p_ref[11] * (z2 * z3)

    d0 = g0 + g0          # 2*g0
    d2 = g2 + g2          # 2*g2
    d3 = g3 + g3          # 2*g3
    t = g4 - g5           # shared by rows 0 and 3
    u = g4 + g5           # row 2

    # xdot = S @ flux, with S even-column entries in {-2,-1,0,1,2}.
    o_ref[0] = t - d0 - g1          # -2*g0 - g1 + g4 - g5
    o_ref[1] = g0 - g3 - g4
    o_ref[2] = g1 + d3 + u          #  g1 + 2*g3 + g4 + g5
    o_ref[3] = -t - g1 - d2         # -g1 - 2*g2 - g4 + g5
    o_ref[4] = g2 - g3 - g5


def rhs_slab_forward(x_slab, p, *, rows_per_block=512):
    """Hot path (keep state in this layout across ODE steps).

    x_slab: (5, R, 128) f32 -- batch element b lives at (row b//128, lane b%128).
    p:      (12,) f32 precomputed reaction rates, p_j = 10**w_j.
    Returns xdot in the same (5, R, 128) layout, f32.
    """
    n_sp, R, lanes = x_slab.shape
    assert n_sp == SIZE_IN and lanes == LANE
    if R <= rows_per_block:
        rt = R                                    # single full-extent block
    else:
        rt = rows_per_block
        if rt % SUBLANE != 0 or R % rt != 0:
            raise ValueError(
                "rows_per_block must be a multiple of 8 that divides R "
                "(pad R once, outside the ODE loop).")
    n_blocks = R // rt

    n_elems = R * LANE
    cost = pl.CostEstimate(
        flops=43 * n_elems,                       # ~43 VPU ops per batch element
        bytes_accessed=2 * SIZE_IN * n_elems * 4,  # 5 f32 in + 5 f32 out
        transcendentals=0)

    return pl.pallas_call(
        _rhs_kernel,
        out_shape=jax.ShapeDtypeStruct((SIZE_IN, R, LANE), jnp.float32),
        grid=(n_blocks,),
        in_specs=[
            pl.BlockSpec(memory_space=pltpu.MemorySpace.SMEM),        # p, resident
            pl.BlockSpec((SIZE_IN, rt, LANE), lambda i: (0, i, 0)),   # x tile
        ],
        out_specs=pl.BlockSpec((SIZE_IN, rt, LANE), lambda i: (0, i, 0)),
        compiler_params=pltpu.CompilerParams(
            dimension_semantics=("parallel",)),   # megacore shards batch blocks
        cost_estimate=cost,
    )(p, x_slab)


def _round_up(a, b):
    return (a + b - 1) // b * b


def rhs_layer_forward_t(x_t, weights, *, tb=65536):
    """Lane-dense convenience path.  x_t: (5, B) f32, weights: (12,) -> (5, B)."""
    B = x_t.shape[1]
    tb = _round_up(max(tb, LANE), SUBLANE * LANE)     # multiple of 1024
    if B <= tb:
        bp = _round_up(B, LANE)
        rows_per_block = bp // LANE
    else:
        bp = _round_up(B, tb)
        rows_per_block = tb // LANE
    if bp != B:
        x_t = jnp.pad(x_t, ((0, 0), (0, bp - B)))    # zero state -> zero xdot
    x_slab = x_t.reshape(SIZE_IN, bp // LANE, LANE)  # contiguous: free reshape

    p = (10.0 ** weights).astype(jnp.float32).reshape(NUM_REACTIONS)

    out = rhs_slab_forward(x_slab, p, rows_per_block=rows_per_block)
    out = out.reshape(SIZE_IN, bp)
    return out[:, :B] if bp != B else out


def rhs_layer_forward(x, weights, *, tb=65536):
    """PyTorch-convention wrapper.  x: (B, 5) f32 -> (B, 5) f32.

    For repeated ODE-step use, prefer rhs_slab_forward with state kept in the
    (5, R, 128) layout; this wrapper's transpose/pad/slice costs extra HBM trips.
    """
    return rhs_layer_forward_t(x.T, weights, tb=tb).T


def _reference_np(x, weights):
    """NumPy float64 reference mirroring the PyTorch batched branch."""
    x = np.asarray(x, dtype=np.float64)
    w = np.asarray(weights, dtype=np.float64)
    z = [x[:, i:i + 1] for i in range(5)]
    preflux = np.concatenate(
        [z[0] * z[0], z[1], z[0] * z[3], z[2], z[3] * z[3], z[4],
         z[1] * z[4], z[2] * z[2], z[1] * z[3], z[2] * z[0],
         z[4] * z[0], z[2] * z[3]], axis=1)
    flux = (10.0 ** w)[None, :] * preflux
    return (flux @ S_NP.T).astype(np.float32)  # torch stores into f32 zeros


if __name__ == "__main__":
    key = jax.random.PRNGKey(0)
    kx1, kx2, kw = jax.random.split(key, 3)

    # nn.init.uniform_ -> U[0, 1) on the 12 reaction-rate exponents.
    weights = jax.random.uniform(kw, (NUM_REACTIONS,), dtype=jnp.float32)

    # Case 1: small ragged batch (single full-extent block, padding exercised).
    B1 = 200
    x1 = jax.random.uniform(kx1, (B1, SIZE_IN), dtype=jnp.float32)
    out1 = jax.block_until_ready(rhs_layer_forward(x1, weights))
    np.testing.assert_allclose(
        np.asarray(out1), _reference_np(np.asarray(x1), np.asarray(weights)),
        rtol=1e-4, atol=1e-4)

    # Case 2: multi-block grid path (tb=1024 -> (5, 8, 128) tiles, 3 grid steps).
    B2 = 2500
    x2 = jax.random.uniform(kx2, (B2, SIZE_IN), dtype=jnp.float32)
    out2 = jax.block_until_ready(rhs_layer_forward(x2, weights, tb=1024))
    np.testing.assert_allclose(
        np.asarray(out2), _reference_np(np.asarray(x2), np.asarray(weights)),
        rtol=1e-4, atol=1e-4)

    print("KERNEL_OK")
</pallas_src>

<mosaic_0001>
module attributes {stable_mosaic.version = 11 : i64} {
  func.func @_rhs_kernel(%arg0: i32, %arg1: memref<12xf32, #tpu.memory_space<smem>>, %arg2: memref<5x2x128xf32, #tpu.memory_space<vmem>>, %arg3: memref<5x2x128xf32, #tpu.memory_space<vmem>>) attributes {dimension_semantics = [#tpu.dimension_semantics<parallel>], iteration_bounds = array<i64: 1>, scalar_prefetch = 0 : i64, scratch_operands = 0 : i64, tpu.core_type = #tpu.core_type<tc>, window_params = [{transform_indices = @transform_0, window_bounds = array<i64: 12>}, {transform_indices = @transform_1, window_bounds = array<i64: 5, 2, 128>}, {transform_indices = @transform_2, window_bounds = array<i64: 5, 2, 128>}]} {
    %c0 = arith.constant 0 : index
    %c0_0 = arith.constant 0 : index
    %c0_1 = arith.constant 0 : index
    %0 = vector.load %arg2[%c0, %c0_0, %c0_1] : memref<5x2x128xf32, #tpu.memory_space<vmem>>, vector<1x2x128xf32>
    %1 = vector.shape_cast %0 : vector<1x2x128xf32> to vector<2x128xf32>
    %c1 = arith.constant 1 : index
    %c0_2 = arith.constant 0 : index
    %c0_3 = arith.constant 0 : index
    %2 = vector.load %arg2[%c1, %c0_2, %c0_3] : memref<5x2x128xf32, #tpu.memory_space<vmem>>, vector<1x2x128xf32>
    %3 = vector.shape_cast %2 : vector<1x2x128xf32> to vector<2x128xf32>
    %c2 = arith.constant 2 : index
    %c0_4 = arith.constant 0 : index
    %c0_5 = arith.constant 0 : index
    %4 = vector.load %arg2[%c2, %c0_4, %c0_5] : memref<5x2x128xf32, #tpu.memory_space<vmem>>, vector<1x2x128xf32>
    %5 = vector.shape_cast %4 : vector<1x2x128xf32> to vector<2x128xf32>
    %c3 = arith.constant 3 : index
    %c0_6 = arith.constant 0 : index
    %c0_7 = arith.constant 0 : index
    %6 = vector.load %arg2[%c3, %c0_6, %c0_7] : memref<5x2x128xf32, #tpu.memory_space<vmem>>, vector<1x2x128xf32>
    %7 = vector.shape_cast %6 : vector<1x2x128xf32> to vector<2x128xf32>
    %c4 = arith.constant 4 : index
    %c0_8 = arith.constant 0 : index
    %c0_9 = arith.constant 0 : index
    %8 = vector.load %arg2[%c4, %c0_8, %c0_9] : memref<5x2x128xf32, #tpu.memory_space<vmem>>, vector<1x2x128xf32>
    %9 = vector.shape_cast %8 : vector<1x2x128xf32> to vector<2x128xf32>
    %c0_10 = arith.constant 0 : index
    %10 = memref.load %arg1[%c0_10] : memref<12xf32, #tpu.memory_space<smem>>
    %11 = arith.mulf %1, %1 : vector<2x128xf32>
    %12 = vector.broadcast %10 : f32 to vector<2x128xf32>
    %13 = arith.mulf %12, %11 : vector<2x128xf32>
    %c1_11 = arith.constant 1 : index
    %14 = memref.load %arg1[%c1_11] : memref<12xf32, #tpu.memory_space<smem>>
    %15 = vector.broadcast %14 : f32 to vector<2x128xf32>
    %16 = arith.mulf %15, %3 : vector<2x128xf32>
    %17 = arith.subf %13, %16 : vector<2x128xf32>
    %c2_12 = arith.constant 2 : index
    %18 = memref.load %arg1[%c2_12] : memref<12xf32, #tpu.memory_space<smem>>
    %19 = arith.mulf %1, %7 : vector<2x128xf32>
    %20 = vector.broadcast %18 : f32 to vector<2x128xf32>
    %21 = arith.mulf %20, %19 : vector<2x128xf32>
    %c3_13 = arith.constant 3 : index
    %22 = memref.load %arg1[%c3_13] : memref<12xf32, #tpu.memory_space<smem>>
    %23 = vector.broadcast %22 : f32 to vector<2x128xf32>
    %24 = arith.mulf %23, %5 : vector<2x128xf32>
    %25 = arith.subf %21, %24 : vector<2x128xf32>
    %c4_14 = arith.constant 4 : index
    %26 = memref.load %arg1[%c4_14] : memref<12xf32, #tpu.memory_space<smem>>
    %27 = arith.mulf %7, %7 : vector<2x128xf32>
    %28 = vector.broadcast %26 : f32 to vector<2x128xf32>
    %29 = arith.mulf %28, %27 : vector<2x128xf32>
    %c5 = arith.constant 5 : index
    %30 = memref.load %arg1[%c5] : memref<12xf32, #tpu.memory_space<smem>>
    %31 = vector.broadcast %30 : f32 to vector<2x128xf32>
    %32 = arith.mulf %31, %9 : vector<2x128xf32>
    %33 = arith.subf %29, %32 : vector<2x128xf32>
    %c6 = arith.constant 6 : index
    %34 = memref.load %arg1[%c6] : memref<12xf32, #tpu.memory_space<smem>>
    %35 = arith.mulf %3, %9 : vector<2x128xf32>
    %36 = vector.broadcast %34 : f32 to vector<2x128xf32>
    %37 = arith.mulf %36, %35 : vector<2x128xf32>
    %c7 = arith.constant 7 : index
    %38 = memref.load %arg1[%c7] : memref<12xf32, #tpu.memory_space<smem>>
    %39 = arith.mulf %5, %5 : vector<2x128xf32>
    %40 = vector.broadcast %38 : f32 to vector<2x128xf32>
    %41 = arith.mulf %40, %39 : vector<2x128xf32>
    %42 = arith.subf %37, %41 : vector<2x128xf32>
    %c8 = arith.constant 8 : index
    %43 = memref.load %arg1[%c8] : memref<12xf32, #tpu.memory_space<smem>>
    %44 = arith.mulf %3, %7 : vector<2x128xf32>
    %45 = vector.broadcast %43 : f32 to vector<2x128xf32>
    %46 = arith.mulf %45, %44 : vector<2x128xf32>
    %c9 = arith.constant 9 : index
    %47 = memref.load %arg1[%c9] : memref<12xf32, #tpu.memory_space<smem>>
    %48 = arith.mulf %5, %1 : vector<2x128xf32>
    %49 = vector.broadcast %47 : f32 to vector<2x128xf32>
    %50 = arith.mulf %49, %48 : vector<2x128xf32>
    %51 = arith.subf %46, %50 : vector<2x128xf32>
    %c10 = arith.constant 10 : index
    %52 = memref.load %arg1[%c10] : memref<12xf32, #tpu.memory_space<smem>>
    %53 = arith.mulf %9, %1 : vector<2x128xf32>
    %54 = vector.broadcast %52 : f32 to vector<2x128xf32>
    %55 = arith.mulf %54, %53 : vector<2x128xf32>
    %c11 = arith.constant 11 : index
    %56 = memref.load %arg1[%c11] : memref<12xf32, #tpu.memory_space<smem>>
    %57 = arith.mulf %5, %7 : vector<2x128xf32>
    %58 = vector.broadcast %56 : f32 to vector<2x128xf32>
    %59 = arith.mulf %58, %57 : vector<2x128xf32>
    %60 = arith.subf %55, %59 : vector<2x128xf32>
    %61 = arith.addf %17, %17 : vector<2x128xf32>
    %62 = arith.addf %33, %33 : vector<2x128xf32>
    %63 = arith.addf %42, %42 : vector<2x128xf32>
    %64 = arith.subf %51, %60 : vector<2x128xf32>
    %65 = arith.addf %51, %60 : vector<2x128xf32>
    %66 = arith.subf %64, %61 : vector<2x128xf32>
    %67 = arith.subf %66, %25 : vector<2x128xf32>
    %c0_15 = arith.constant 0 : index
    %c0_16 = arith.constant 0 : index
    %c0_17 = arith.constant 0 : index
    %68 = vector.load %arg3[%c0_15, %c0_16, %c0_17] : memref<5x2x128xf32, #tpu.memory_space<vmem>>, vector<1x2x128xf32>
    %69 = vector.shape_cast %68 : vector<1x2x128xf32> to vector<2x128xf32>
    %70 = vector.shape_cast %67 : vector<2x128xf32> to vector<1x2x128xf32>
    tpu.vector_store %arg3[%c0_15, %c0_16, %c0_17], %70 {strides = array<i32>} : memref<5x2x128xf32, #tpu.memory_space<vmem>>, vector<1x2x128xf32>,
    %71 = arith.subf %17, %42 : vector<2x128xf32>
    %72 = arith.subf %71, %51 : vector<2x128xf32>
    %c1_18 = arith.constant 1 : index
    %c0_19 = arith.constant 0 : index
    %c0_20 = arith.constant 0 : index
    %73 = vector.load %arg3[%c1_18, %c0_19, %c0_20] : memref<5x2x128xf32, #tpu.memory_space<vmem>>, vector<1x2x128xf32>
    %74 = vector.shape_cast %73 : vector<1x2x128xf32> to vector<2x128xf32>
    %75 = vector.shape_cast %72 : vector<2x128xf32> to vector<1x2x128xf32>
    tpu.vector_store %arg3[%c1_18, %c0_19, %c0_20], %75 {strides = array<i32>} : memref<5x2x128xf32, #tpu.memory_space<vmem>>, vector<1x2x128xf32>,
    %76 = arith.addf %25, %63 : vector<2x128xf32>
    %77 = arith.addf %76, %65 : vector<2x128xf32>
    %c2_21 = arith.constant 2 : index
    %c0_22 = arith.constant 0 : index
    %c0_23 = arith.constant 0 : index
    %78 = vector.load %arg3[%c2_21, %c0_22, %c0_23] : memref<5x2x128xf32, #tpu.memory_space<vmem>>, vector<1x2x128xf32>
    %79 = vector.shape_cast %78 : vector<1x2x128xf32> to vector<2x128xf32>
    %80 = vector.shape_cast %77 : vector<2x128xf32> to vector<1x2x128xf32>
    tpu.vector_store %arg3[%c2_21, %c0_22, %c0_23], %80 {strides = array<i32>} : memref<5x2x128xf32, #tpu.memory_space<vmem>>, vector<1x2x128xf32>,
    %cst = arith.constant 0.000000e+00 : f32
    %81 = vector.broadcast %cst : f32 to vector<2x128xf32>
    %82 = arith.subf %81, %64 : vector<2x128xf32>
    %83 = arith.subf %82, %25 : vector<2x128xf32>
    %84 = arith.subf %83, %62 : vector<2x128xf32>
    %c3_24 = arith.constant 3 : index
    %c0_25 = arith.constant 0 : index
    %c0_26 = arith.constant 0 : index
    %85 = vector.load %arg3[%c3_24, %c0_25, %c0_26] : memref<5x2x128xf32, #tpu.memory_space<vmem>>, vector<1x2x128xf32>
    %86 = vector.shape_cast %85 : vector<1x2x128xf32> to vector<2x128xf32>
    %87 = vector.shape_cast %84 : vector<2x128xf32> to vector<1x2x128xf32>
    tpu.vector_store %arg3[%c3_24, %c0_25, %c0_26], %87 {strides = array<i32>} : memref<5x2x128xf32, #tpu.memory_space<vmem>>, vector<1x2x128xf32>,
    %88 = arith.subf %33, %42 : vector<2x128xf32>
    %89 = arith.subf %88, %60 : vector<2x128xf32>
    %c4_27 = arith.constant 4 : index
    %c0_28 = arith.constant 0 : index
    %c0_29 = arith.constant 0 : index
    %90 = vector.load %arg3[%c4_27, %c0_28, %c0_29] : memref<5x2x128xf32, #tpu.memory_space<vmem>>, vector<1x2x128xf32>
    %91 = vector.shape_cast %90 : vector<1x2x128xf32> to vector<2x128xf32>
    %92 = vector.shape_cast %89 : vector<2x128xf32> to vector<1x2x128xf32>
    tpu.vector_store %arg3[%c4_27, %c0_28, %c0_29], %92 {strides = array<i32>} : memref<5x2x128xf32, #tpu.memory_space<vmem>>, vector<1x2x128xf32>,
    return
  }
  func.func @transform_0(%arg0: i32) -> i32 {
    %c0_i32 = arith.constant 0 : i32
    %c0_i32_0 = arith.constant 0 : i32
    return %c0_i32 : i32
  }
  func.func @transform_1(%arg0: i32) -> (i32, i32, i32) {
    %c0_i32 = arith.constant 0 : i32
    %c0_i32_0 = arith.constant 0 : i32
    %c0_i32_1 = arith.constant 0 : i32
    return %c0_i32, %arg0, %c0_i32_0 : i32, i32, i32
  }
  func.func @transform_2(%arg0: i32) -> (i32, i32, i32) {
    %c0_i32 = arith.constant 0 : i32
    %c0_i32_0 = arith.constant 0 : i32
    %c0_i32_1 = arith.constant 0 : i32
    return %c0_i32, %arg0, %c0_i32_0 : i32, i32, i32
  }
}

</mosaic_0001>

<bundles_post_ra>
// kernel: tpu_custom_call.1
= control target key start
LH: loop header
LB: loop body
LE: loop exit
PB: predicated region body
PF: predicated region fallthrough
CT: control target
= control target key end

     0   :  { %7 = vsyncpa [#allocation5], 0  ;;  %s284_s0 = inlined_call_operand.hbm [shape: f32[12], index: 0, kind: input, shape index: {}]   ;;  %s285_s1 = inlined_call_operand.hbm [shape: f32[5,2,128], index: 1, kind: input, shape index: {}]   ;;  %s286_s2 = inlined_call_operand.hbm [shape: f32[5,2,128], index: 2, kind: output, shape index: {}]  }
   0x1   :  { %8 = vsyncpa [#allocation3], 0 }
   0x2   :  { %9 = vsyncpa [#allocation4], 0  ;;  %s156_s11 = scalar_lea.hbm %s284_s0, 16 }
   0x3   :  { %p157_p0 = scmp.ne.s32.totalorder %s284_s0, %s156_s11  ;;  %p160_p1 = scmp.lt.u32.totalorder %s156_s11, %s284_s0 }
   0x5   :  { %p162_p2 = pnand %p160_p1, %p157_p0 }
   0x7   :  { %165 = shalt.err (!%p162_p2)
}
   0x8   :  { %s216_s16 = smov [#allocation2]   ;;  %s217_s19 = smov [#allocation6]  }
   0x9   :  { %17 = dma.hbm_to_smem %s284_s0, 16, %s216_s16, [#allocation5]  }
   0xa   :  { %s23_s20 = sshll.u32 %s217_s19, 4  ;;  %s166_s23 = scalar_lea.hbm %s285_s1, 160  ;;  %s24_s20 = int_to_ptr.vmem [resolvable:$true] %s23_s20 }
   0xb   :  { %p167_p3 = scmp.ne.s32.totalorder %s285_s1, %s166_s23  ;;  %p170_p4 = scmp.lt.u32.totalorder %s166_s23, %s285_s1 }
   0xd   :  { %p172_p5 = pnand %p170_p4, %p167_p3 }
   0xf   :  { %175 = shalt.err (!%p172_p5)
}
  0x10   :  { %s176_s28 = scalar_lea.vmem %s24_s20, 160  ;;  %p181_p7 = scmp.lt.s32.totalorder %s24_s20, %s24_s20 }
  0x11   :  { %p177_p6 = scmp.ne.s32.totalorder %s24_s20, %s176_s28  ;;  %p182_p8 = scmp.lt.s32.totalorder %s176_s28, %s176_s28 }
  0x13   :  { %p183_p9 = por %p182_p8, %p181_p7 }
  0x15   :  { %p184_p10 = pnand %p183_p9, %p177_p6 }
  0x17   :  { %187 = shalt.err (!%p184_p10)
}
  0x18   :  { %s218_s0 = smov 32   ;;  %s219_s29 = smov 2  }
  0x19   :  { %29 = dma.hbm_to_vmem [thread:$0]  %s285_s1, 160, %s24_s20, [#allocation3], %s218_s0, %s218_s0, %s219_s29  }
  0x1a   :  { %210 = dma.done.wait [#allocation5], 16  }
  0x1b   :  { %211 = vsyncadd [#allocation5], 4294967280 }
  0x1c   :  { %212 = dma.done.wait [#allocation3], 160  }
  0x1d   :  { %213 = vsyncadd [#allocation3], 4294967136 }
  0x1e   :  { %36 = sfence }
  0x1f   :  { %v37_v0 = vld [vmem:[#allocation6] sm:$0x3]  ;;  %v39_v1 = vld [vmem:[#allocation6 + $0x2] sm:$0x3]  ;;  %s46_s4 = sld [smem:[#allocation2]]  ;;  %s140_s5 = sld [smem:[#allocation2 + $0x1]] }
  0x20   :  { %v41_v2 = vld [vmem:[#allocation6 + $0x4] sm:$0x3]  ;;  %s141_s6 = sld [smem:[#allocation2 + $0x2]]  ;;  %v43_v3 = vld [vmem:[#allocation6 + $0x6] sm:$0x3]  ;;  %s142_s7 = sld [smem:[#allocation2 + $0x3]]  ;;  %v47_v5 = vmul.f32 %v37_v0, %v37_v0 }
  0x21   :  { %s147_s8 = sld [smem:[#allocation2 + $0x8]]  ;;  %v45_v4 = vld [vmem:[#allocation6 + $0x8] sm:$0x3]  ;;  %s148_s9 = sld [smem:[#allocation2 + $0x9]]  ;;  %v55_v6 = vmul.f32 %v43_v3, %v37_v0  ;;  %v80_v7 = vmul.f32 %v43_v3, %v39_v1  ;;  %v84_v8 = vmul.f32 %v41_v2, %v37_v0  ;;  %v75_v9 = vmul.f32 %v41_v2, %v41_v2 }
  0x22   :  { %s149_s10 = sld [smem:[#allocation2 + $0xa]]  ;;  %s150_s1 = sld [smem:[#allocation2 + $0xb]]  ;;  %v89_v11 = vmul.f32 %v45_v4, %v37_v0  ;;  %v93_v12 = vmul.f32 %v43_v3, %v41_v2  ;;  %v71_v13 = vmul.f32 %v45_v4, %v39_v1  ;;  %v63_v17 = vmul.f32 %v43_v3, %v43_v3 }
  0x23   :  { %s263_s11 = sld [smem:[#allocation2 + $0x6]]  ;;  %s146_s12 = sld [smem:[#allocation2 + $0x7]] }
  0x24   :  { %s265_s13 = sld [smem:[#allocation2 + $0x4]]  ;;  %s144_s14 = sld [smem:[#allocation2 + $0x5]] }
  0x25   :  { %v48_v10 = vstv %s46_s4  ;;  %v51_v15 = vstv %s140_s5  ;;  %s220_s15 = smov [#allocation7]  }
  0x26   :  { %v49_v14 = vmul.f32 %v48_v10, %v47_v5  ;;  %v56_v16 = vstv %s141_s6  ;;  %v52_v18 = vmul.f32 %v51_v15, %v39_v1  ;;  %v59_v20 = vstv %s142_s7  ;;  %s127_s16 = sshll.u32 %s220_s15, 4  ;;  %s128_s16 = int_to_ptr.vmem [resolvable:$true] %s127_s16 }
  0x27   :  { %v57_v19 = vmul.f32 %v56_v16, %v55_v6  ;;  %v81_v21 = vstv %s147_s8  ;;  %v60_v22 = vmul.f32 %v59_v20, %v41_v2  ;;  %v85_v24 = vstv %s148_s9  ;;  %s188_s17 = scalar_lea.vmem %s128_s16, 160  ;;  %p193_p12 = scmp.lt.s32.totalorder %s128_s16, %s128_s16 }
  0x28   :  { %v82_v23 = vmul.f32 %v81_v21, %v80_v7  ;;  %v90_v25 = vstv %s149_s10  ;;  %v53_v26 = vsub.f32 %v49_v14, %v52_v18  ;;  %v86_v27 = vmul.f32 %v85_v24, %v84_v8  ;;  %p189_p11 = scmp.ne.s32.totalorder %s128_s16, %s188_s17  ;;  %p194_p13 = scmp.lt.s32.totalorder %s188_s17, %s188_s17 }
  0x29   :  { %v91_v28 = vmul.f32 %v90_v25, %v89_v11  ;;  %v94_v29 = vstv %s150_s1  ;;  %v72_v31 = vstv %s263_s11  ;;  %v76_v32 = vstv %s146_s12 }
  0x2a   :  { %v95_v30 = vmul.f32 %v94_v29, %v93_v12  ;;  %v87_v33 = vsub.f32 %v82_v23, %v86_v27  ;;  %v73_v34 = vmul.f32 %v72_v31, %v71_v13  ;;  %v77_v35 = vmul.f32 %v76_v32, %v75_v9  ;;  %p195_p0 = por %p194_p13, %p193_p12 }
  0x2b   :  { %v97_v37 = vadd.f32 %v53_v26, %v53_v26  ;;  %v64_v38 = vstv %s265_s13  ;;  %v67_v39 = vstv %s144_s14  ;;  %v61_v40 = vsub.f32 %v57_v19, %v60_v22 }
  0x2c   :  { %v96_v36 = vsub.f32 %v91_v28, %v95_v30  ;;  %v78_v41 = vsub.f32 %v73_v34, %v77_v35  ;;  %v65_v42 = vmul.f32 %v64_v38, %v63_v17  ;;  %v68_v43 = vmul.f32 %v67_v39, %v45_v4  ;;  %p196_p1 = pnand %p195_p0, %p189_p11 }
  0x2e   :  { %v100_v44 = vsub.f32 %v87_v33, %v96_v36  ;;  %v105_v45 = vsub.f32 %v53_v26, %v78_v41  ;;  %v99_v46 = vadd.f32 %v78_v41, %v78_v41  ;;  %v101_v47 = vadd.f32 %v96_v36, %v87_v33 }
  0x2f   :  { %v69_v48 = vsub.f32 %v65_v42, %v68_v43 }
  0x30   :  { %v102_v49 = vsub.f32 %v100_v44, %v97_v37  ;;  %v113_v50 = vsub.f32 0.0, %v100_v44  ;;  %v106_v51 = vsub.f32 %v105_v45, %v87_v33  ;;  %v109_v52 = vadd.f32 %v99_v46, %v61_v40 }
  0x31   :  { %v98_v53 = vadd.f32 %v69_v48, %v69_v48  ;;  %v118_v54 = vsub.f32 %v69_v48, %v78_v41 }
  0x32   :  { %v103_v55 = vsub.f32 %v102_v49, %v61_v40  ;;  %v114_v56 = vsub.f32 %v113_v50, %v61_v40  ;;  %108 = vst [vmem:[#allocation7 + $0x2] sm:$0x3] %v106_v51  ;;  %v110_v57 = vadd.f32 %v109_v52, %v101_v47 }
  0x33   :  { %v119_v58 = vsub.f32 %v118_v54, %v96_v36 }
  0x34   :  { %104 = vst [vmem:[#allocation7] sm:$0x3] %v103_v55  ;;  %v115_v59 = vsub.f32 %v114_v56, %v98_v53  ;;  %112 = vst [vmem:[#allocation7 + $0x4] sm:$0x3] %v110_v57 }
  0x35   :  { %121 = vst [vmem:[#allocation7 + $0x8] sm:$0x3] %v119_v58 }
  0x36   :  { %117 = vst [vmem:[#allocation7 + $0x6] sm:$0x3] %v115_v59 }
  0x37   :  { %199 = shalt.err (!%p196_p1)
}
  0x38   :  { %s200_s20 = scalar_lea.hbm %s286_s2, 160 }
  0x39   :  { %p201_p2 = scmp.ne.s32.totalorder %s286_s2, %s200_s20  ;;  %p204_p3 = scmp.lt.u32.totalorder %s200_s20, %s286_s2 }
  0x3b   :  { %p206_p4 = pnand %p204_p3, %p201_p2 }
  0x3d   :  { %209 = shalt.err (!%p206_p4)
}
  0x3e   :  { %133 = dma.vmem_to_hbm [thread:$0]  %s128_s16, 160, %s286_s2, [#allocation4], %s218_s0, %s218_s0, %s219_s29  }
  0x3f   :  { %214 = dma.done.wait [#allocation4], 160  }
  0x40   :  { %215 = vsyncadd [#allocation4], 4294967136 }
  0x41   :  { %137 = vsyncpa [#allocation3], 1 }
  0x42   :  { %138 = vsyncpa [#allocation4], 1 }
  0x43   :  { %139 = vsyncpa [#allocation5], 1 }

</bundles_post_ra>
